<compile_context>
chip_gen: v6e
topology: v6e:2x2x1
jax: 0.10.0
libtpu: 0.0.40
codegen_flags: <defaults>
</compile_context>

<pallas_src>
import math

import jax
import jax.numpy as jnp
from jax.experimental import pallas as pl
from jax.experimental.pallas import tpu as pltpu

LANE = 128   # lane tile
SUB = 16     # sublane alignment (bf16 packs 16 rows / vreg)


def _round_up(v, m):
    return ((v + m - 1) // m) * m


def _tiling(m, block_m):
    """Balanced M tiling: >=2 blocks when possible (v7x megacore), waste <= SUB."""
    n_blocks = max(pl.cdiv(m, block_m), min(2, pl.cdiv(m, SUB)))
    tm = _round_up(pl.cdiv(m, n_blocks), SUB)
    m_pad = _round_up(m, tm)
    return tm, m_pad


# ---------------------------------------------------------------------------
# Pallas kernels
# ---------------------------------------------------------------------------
def _conv_pool_kernel(p_ref, w_ref, b_ref, o_ref):
    """Fused im2col-matmul + bias + 2x2/2 max-pool + ReLU.

    p_ref: (4, tm, Kp) bf16  -- 4 pool-window taps of im2col patches
    w_ref: (Kp, Cp)    bf16  -- conv weight as a matrix, K rows = (kh, kw, ic)
    b_ref: (1, Cp)     f32
    o_ref: (tm, Cp)    bf16  -- pooled + ReLU'd activations
    """
    tm = o_ref.shape[0]
    # One long LHS keeps the MXU fed with a single uninterrupted push; the
    # pool max happens afterwards on the f32 result slabs (VPU).
    lhs = jnp.concatenate([p_ref[0], p_ref[1], p_ref[2], p_ref[3]], axis=0)
    acc = jnp.dot(lhs, w_ref[...], preferred_element_type=jnp.float32)  # (4*tm, Cp)
    pooled = jnp.maximum(jnp.maximum(acc[:tm], acc[tm:2 * tm]),
                         jnp.maximum(acc[2 * tm:3 * tm], acc[3 * tm:]))
    # max(relu(x_t + b)) == relu(max(x_t) + b)  (monotone, b shared by taps)
    o_ref[...] = jnp.maximum(pooled + b_ref[...], 0.0).astype(o_ref.dtype)


def _mlp_kernel(x_ref, w1_ref, b1_ref, w2_ref, b2_ref, w3_ref, b3_ref, o_ref):
    """Fused fc1+ReLU -> fc2+ReLU -> out.  f32 accumulate, f32 epilogue."""
    h = jnp.dot(x_ref[...], w1_ref[...], preferred_element_type=jnp.float32)
    h = jnp.maximum(h + b1_ref[...], 0.0)
    h = jnp.dot(h.astype(w2_ref.dtype), w2_ref[...],
                preferred_element_type=jnp.float32)
    h = jnp.maximum(h + b2_ref[...], 0.0)
    h = jnp.dot(h.astype(w3_ref.dtype), w3_ref[...],
                preferred_element_type=jnp.float32)
    o_ref[...] = h + b3_ref[...]


# ---------------------------------------------------------------------------
# Stage wrappers
# ---------------------------------------------------------------------------
def conv_relu_pool(x_nhwc, w_mat, b_row, out_channels, *, block_m=512):
    """5x5 valid conv + bias + ReLU + 2x2/2 max-pool, fused in one pallas_call.

    x_nhwc: (N, H, W, C);  w_mat: (Kp, Cp) bf16 pre-padded;  b_row: (1, Cp) f32.
    Returns (N, H', W', out_channels) bf16 with H' = (H-4)//2.
    """
    x = x_nhwc.astype(jnp.bfloat16)            # cast BEFORE the im2col relayout
    n, h, w, c = x.shape
    kh = kw = 5
    oh, ow = h - kh + 1, w - kw + 1
    ph, pw = oh // 2, ow // 2
    k = kh * kw * c
    kp, cp = w_mat.shape

    # im2col (XLA glue, all bf16), arranged pool-tap-major: P[t, m, :] is the
    # patch of conv-output pixel (2*ph_i + u, 2*pw_i + v) with t = 2*u + v and
    # m = ((n_i * PH) + ph_i) * PW + pw_i.  K is ordered (kh, kw, ic).
    taps = [x[:, i:i + oh, j:j + ow, :] for i in range(kh) for j in range(kw)]
    p = jnp.stack(taps, axis=3)                      # (n, oh, ow, kh*kw, c)
    p = p.reshape(n, ph, 2, pw, 2, k)                # split the 2x2 pool windows
    p = jnp.transpose(p, (2, 4, 0, 1, 3, 5))         # (u, v, n, ph, pw, k)
    m = n * ph * pw
    p = p.reshape(4, m, k)

    tm, m_pad = _tiling(m, block_m)                  # blocks never go OOB
    p = jnp.pad(p, ((0, 0), (0, m_pad - m), (0, kp - k)))

    out = pl.pallas_call(
        _conv_pool_kernel,
        grid=(m_pad // tm,),
        out_shape=jax.ShapeDtypeStruct((m_pad, cp), jnp.bfloat16),
        in_specs=[
            pl.BlockSpec((4, tm, kp), lambda i: (0, i, 0)),   # patches: tiled over M
            pl.BlockSpec((kp, cp), lambda i: (0, 0)),         # weight: resident
            pl.BlockSpec((1, cp), lambda i: (0, 0)),          # bias:   resident
        ],
        out_specs=pl.BlockSpec((tm, cp), lambda i: (i, 0)),
        compiler_params=pltpu.CompilerParams(
            dimension_semantics=("parallel",)
        ),
    )(p, w_mat, b_row)
    return out[:m, :out_channels].reshape(n, ph, pw, out_channels)


def mlp_head(x2d, pp, *, block_m=512):
    """Fused fc1(+ReLU) -> fc2(+ReLU) -> out.  x2d: (N, 192) -> (N, 10) f32."""
    n, k = x2d.shape
    w1, b1 = pp["fc1_w"], pp["fc1_b"]
    w2, b2 = pp["fc2_w"], pp["fc2_b"]
    w3, b3 = pp["out_w"], pp["out_b"]
    k1p = w1.shape[0]                                # 192 (real fc1 width)
    cp = w3.shape[1]

    tm, m_pad = _tiling(n, block_m)
    xp = jnp.pad(x2d.astype(jnp.bfloat16), ((0, m_pad - n), (0, k1p - k)))

    out = pl.pallas_call(
        _mlp_kernel,
        grid=(m_pad // tm,),
        out_shape=jax.ShapeDtypeStruct((m_pad, cp), jnp.float32),
        in_specs=[
            pl.BlockSpec((tm, k1p), lambda i: (i, 0)),
            pl.BlockSpec(w1.shape, lambda i: (0, 0)),
            pl.BlockSpec(b1.shape, lambda i: (0, 0)),
            pl.BlockSpec(w2.shape, lambda i: (0, 0)),
            pl.BlockSpec(b2.shape, lambda i: (0, 0)),
            pl.BlockSpec(w3.shape, lambda i: (0, 0)),
            pl.BlockSpec(b3.shape, lambda i: (0, 0)),
        ],
        out_specs=pl.BlockSpec((tm, cp), lambda i: (i, 0)),
        compiler_params=pltpu.CompilerParams(
            dimension_semantics=("parallel",)
        ),
    )(xp, w1, b1, w2, b2, w3, b3)
    return out[:n, :10]


# ---------------------------------------------------------------------------
# Parameters: PyTorch-default-style init + one-time TPU layout preparation
# ---------------------------------------------------------------------------
def init_params(key):
    def uniform(k, shape, fan_in):
        bound = 1.0 / math.sqrt(fan_in)
        return jax.random.uniform(k, shape, minval=-bound, maxval=bound,
                                  dtype=jnp.float32)

    ks = jax.random.split(key, 10)
    return {
        "conv1_w": uniform(ks[0], (6, 1, 5, 5), 1 * 5 * 5),
        "conv1_b": uniform(ks[1], (6,), 1 * 5 * 5),
        "conv2_w": uniform(ks[2], (12, 6, 5, 5), 6 * 5 * 5),
        "conv2_b": uniform(ks[3], (12,), 6 * 5 * 5),
        "fc1_w": uniform(ks[4], (120, 192), 192),   # (out, in), torch layout
        "fc1_b": uniform(ks[5], (120,), 192),
        "fc2_w": uniform(ks[6], (60, 120), 120),
        "fc2_b": uniform(ks[7], (60,), 120),
        "out_w": uniform(ks[8], (10, 60), 60),
        "out_b": uniform(ks[9], (10,), 60),
    }


def prepare_params(params):
    """One-time layout prep: transpose/permute, zero-pad rows only to the bf16
    sublane multiple (not 128), columns to 128 lanes; matmul operands bf16,
    biases f32 for the f32 epilogue."""

    def pad2(a, rows, cols):
        return jnp.pad(a, ((0, rows - a.shape[0]), (0, cols - a.shape[1])))

    def conv_wmat(w_oihw):
        oc, ic, kh, kw = w_oihw.shape
        k = kh * kw * ic
        wm = jnp.transpose(w_oihw, (2, 3, 1, 0)).reshape(k, oc)  # rows=(kh,kw,ic)
        return pad2(wm, _round_up(k, SUB), LANE).astype(jnp.bfloat16)

    def fc_wmat(w_oi, rows):
        wm = w_oi.T                                              # (in, out)
        return pad2(wm, rows, LANE).astype(jnp.bfloat16)

    def bias_row(b):
        return jnp.pad(b, (0, LANE - b.shape[0]))[None, :].astype(jnp.float32)

    # PyTorch flattens the conv stack in NCHW (c,h,w) order; our pooled
    # activations flatten in NHWC (h,w,c) order -> permute fc1's input axis
    # once here so the runtime flatten is a plain reshape.
    fc1_w = params["fc1_w"].reshape(120, 12, 4, 4)
    fc1_w = jnp.transpose(fc1_w, (0, 2, 3, 1)).reshape(120, 192)

    return {
        "conv1_w": conv_wmat(params["conv1_w"]),   # (32, 128)
        "conv1_b": bias_row(params["conv1_b"]),
        "conv2_w": conv_wmat(params["conv2_w"]),   # (160, 128)
        "conv2_b": bias_row(params["conv2_b"]),
        # fc1 contracts against the explicitly padded 192-wide x
        "fc1_w": fc_wmat(fc1_w, 192),              # (192, 128)
        "fc1_b": bias_row(params["fc1_b"]),
        # fc2/out contract against the previous layer's 128-lane output
        "fc2_w": fc_wmat(params["fc2_w"], LANE),   # (128, 128)
        "fc2_b": bias_row(params["fc2_b"]),
        "out_w": fc_wmat(params["out_w"], LANE),   # (128, 128)
        "out_b": bias_row(params["out_b"]),
    }


# ---------------------------------------------------------------------------
# Forward pass (mirrors Network.forward)
# ---------------------------------------------------------------------------
@jax.jit
def network_forward(prep, t_nchw):
    x = jnp.transpose(t_nchw, (0, 2, 3, 1))                           # NHWC
    x = conv_relu_pool(x, prep["conv1_w"], prep["conv1_b"], 6)        # (N,12,12,6)  bf16
    x = conv_relu_pool(x, prep["conv2_w"], prep["conv2_b"], 12)       # (N,4,4,12)   bf16
    x = x.reshape(x.shape[0], 4 * 4 * 12)                             # (h,w,c) flatten
    return mlp_head(x, prep)                                          # (N,10) f32


# ---------------------------------------------------------------------------
if __name__ == "__main__":
    key = jax.random.PRNGKey(0)
    k_params, k_input = jax.random.split(key)

    params = init_params(k_params)
    prep = prepare_params(params)

    # batch=2, 1 channel, 28x28 (so 12*4*4 matches after the two conv stages)
    t = jax.random.normal(k_input, (2, 1, 28, 28), dtype=jnp.float32)

    logits = network_forward(prep, t)
    logits = jax.block_until_ready(logits)

    assert logits.shape == (2, 10), logits.shape
    assert bool(jnp.all(jnp.isfinite(logits)))
    print("KERNEL_OK")
</pallas_src>

<mosaic_0001>
module attributes {stable_mosaic.version = 11 : i64} {
  func.func @_conv_pool_kernel(%arg0: i32, %arg1: memref<4x144x32xbf16, #tpu.memory_space<vmem>>, %arg2: memref<32x128xbf16, #tpu.memory_space<vmem>>, %arg3: memref<1x128xf32, #tpu.memory_space<vmem>>, %arg4: memref<144x128xbf16, #tpu.memory_space<vmem>>) attributes {dimension_semantics = [#tpu.dimension_semantics<parallel>], iteration_bounds = array<i64: 2>, scalar_prefetch = 0 : i64, scratch_operands = 0 : i64, tpu.core_type = #tpu.core_type<tc>, window_params = [{transform_indices = @transform_0, window_bounds = array<i64: 4, 144, 32>}, {pipeline_mode = #tpu.pipeline_mode<synchronous>, transform_indices = @transform_1, window_bounds = array<i64: 32, 128>}, {pipeline_mode = #tpu.pipeline_mode<synchronous>, transform_indices = @transform_2, window_bounds = array<i64: 1, 128>}, {transform_indices = @transform_3, window_bounds = array<i64: 144, 128>}]} {
    %c0 = arith.constant 0 : index
    %c0_0 = arith.constant 0 : index
    %c0_1 = arith.constant 0 : index
    %0 = vector.load %arg1[%c0, %c0_0, %c0_1] : memref<4x144x32xbf16, #tpu.memory_space<vmem>>, vector<1x144x32xbf16>
    %1 = vector.shape_cast %0 : vector<1x144x32xbf16> to vector<144x32xbf16>
    %c1 = arith.constant 1 : index
    %c0_2 = arith.constant 0 : index
    %c0_3 = arith.constant 0 : index
    %2 = vector.load %arg1[%c1, %c0_2, %c0_3] : memref<4x144x32xbf16, #tpu.memory_space<vmem>>, vector<1x144x32xbf16>
    %3 = vector.shape_cast %2 : vector<1x144x32xbf16> to vector<144x32xbf16>
    %c2 = arith.constant 2 : index
    %c0_4 = arith.constant 0 : index
    %c0_5 = arith.constant 0 : index
    %4 = vector.load %arg1[%c2, %c0_4, %c0_5] : memref<4x144x32xbf16, #tpu.memory_space<vmem>>, vector<1x144x32xbf16>
    %5 = vector.shape_cast %4 : vector<1x144x32xbf16> to vector<144x32xbf16>
    %c3 = arith.constant 3 : index
    %c0_6 = arith.constant 0 : index
    %c0_7 = arith.constant 0 : index
    %6 = vector.load %arg1[%c3, %c0_6, %c0_7] : memref<4x144x32xbf16, #tpu.memory_space<vmem>>, vector<1x144x32xbf16>
    %7 = vector.shape_cast %6 : vector<1x144x32xbf16> to vector<144x32xbf16>
    %8 = tpu.concatenate %1, %3, %5, %7 in 0 : vector<144x32xbf16>, vector<144x32xbf16>, vector<144x32xbf16>, vector<144x32xbf16> -> vector<576x32xbf16>
    %c0_8 = arith.constant 0 : index
    %c0_9 = arith.constant 0 : index
    %9 = vector.load %arg2[%c0_8, %c0_9] : memref<32x128xbf16, #tpu.memory_space<vmem>>, vector<32x128xbf16>
    %cst = arith.constant dense<0.000000e+00> : vector<576x128xf32>
    %10 = tpu.matmul %8, %9, %cst {dimension_numbers = #tpu.dot_dimension_numbers<[1], [0], [0], [1], [0, 0, 1, 1], [], []>} : vector<576x32xbf16>, vector<32x128xbf16>, vector<576x128xf32> -> vector<576x128xf32>
    %11 = vector.extract_strided_slice %10 {offsets = [0, 0], sizes = [144, 128], strides = [1, 1]} : vector<576x128xf32> to vector<144x128xf32>
    %12 = vector.extract_strided_slice %10 {offsets = [144, 0], sizes = [144, 128], strides = [1, 1]} : vector<576x128xf32> to vector<144x128xf32>
    %13 = arith.maximumf %11, %12 : vector<144x128xf32>
    %14 = vector.extract_strided_slice %10 {offsets = [288, 0], sizes = [144, 128], strides = [1, 1]} : vector<576x128xf32> to vector<144x128xf32>
    %15 = vector.extract_strided_slice %10 {offsets = [432, 0], sizes = [144, 128], strides = [1, 1]} : vector<576x128xf32> to vector<144x128xf32>
    %16 = arith.maximumf %14, %15 : vector<144x128xf32>
    %17 = arith.maximumf %13, %16 : vector<144x128xf32>
    %c0_10 = arith.constant 0 : index
    %c0_11 = arith.constant 0 : index
    %18 = vector.load %arg3[%c0_10, %c0_11] : memref<1x128xf32, #tpu.memory_space<vmem>>, vector<1x128xf32>
    %19 = vector.broadcast %18 : vector<1x128xf32> to vector<144x128xf32>
    %20 = arith.addf %17, %19 : vector<144x128xf32>
    %cst_12 = arith.constant 0.000000e+00 : f32
    %21 = vector.broadcast %cst_12 : f32 to vector<144x128xf32>
    %22 = arith.maximumf %20, %21 : vector<144x128xf32>
    %23 = arith.truncf %22 : vector<144x128xf32> to vector<144x128xbf16>
    %c0_13 = arith.constant 0 : index
    %c0_14 = arith.constant 0 : index
    %24 = vector.load %arg4[%c0_13, %c0_14] : memref<144x128xbf16, #tpu.memory_space<vmem>>, vector<144x128xbf16>
    tpu.vector_store %arg4[%c0_13, %c0_14], %23 {strides = array<i32>} : memref<144x128xbf16, #tpu.memory_space<vmem>>, vector<144x128xbf16>,
    return
  }
  func.func @transform_0(%arg0: i32) -> (i32, i32, i32) {
    %c0_i32 = arith.constant 0 : i32
    %c0_i32_0 = arith.constant 0 : i32
    %c0_i32_1 = arith.constant 0 : i32
    return %c0_i32, %arg0, %c0_i32_0 : i32, i32, i32
  }
  func.func @transform_1(%arg0: i32) -> (i32, i32) {
    %c0_i32 = arith.constant 0 : i32
    %c0_i32_0 = arith.constant 0 : i32
    %c0_i32_1 = arith.constant 0 : i32
    return %c0_i32, %c0_i32_0 : i32, i32
  }
  func.func @transform_2(%arg0: i32) -> (i32, i32) {
    %c0_i32 = arith.constant 0 : i32
    %c0_i32_0 = arith.constant 0 : i32
    %c0_i32_1 = arith.constant 0 : i32
    return %c0_i32, %c0_i32_0 : i32, i32
  }
  func.func @transform_3(%arg0: i32) -> (i32, i32) {
    %c0_i32 = arith.constant 0 : i32
    %c0_i32_0 = arith.constant 0 : i32
    return %arg0, %c0_i32 : i32, i32
  }
}

module attributes {stable_mosaic.version = 11 : i64} {
  func.func @_conv_pool_kernel(%arg0: i32, %arg1: memref<4x16x160xbf16, #tpu.memory_space<vmem>>, %arg2: memref<160x128xbf16, #tpu.memory_space<vmem>>, %arg3: memref<1x128xf32, #tpu.memory_space<vmem>>, %arg4: memref<16x128xbf16, #tpu.memory_space<vmem>>) attributes {dimension_semantics = [#tpu.dimension_semantics<parallel>], iteration_bounds = array<i64: 2>, scalar_prefetch = 0 : i64, scratch_operands = 0 : i64, tpu.core_type = #tpu.core_type<tc>, window_params = [{transform_indices = @transform_0, window_bounds = array<i64: 4, 16, 160>}, {pipeline_mode = #tpu.pipeline_mode<synchronous>, transform_indices = @transform_1, window_bounds = array<i64: 160, 128>}, {pipeline_mode = #tpu.pipeline_mode<synchronous>, transform_indices = @transform_2, window_bounds = array<i64: 1, 128>}, {transform_indices = @transform_3, window_bounds = array<i64: 16, 128>}]} {
    %c0 = arith.constant 0 : index
    %c0_0 = arith.constant 0 : index
    %c0_1 = arith.constant 0 : index
    %0 = vector.load %arg1[%c0, %c0_0, %c0_1] : memref<4x16x160xbf16, #tpu.memory_space<vmem>>, vector<1x16x160xbf16>
    %1 = vector.shape_cast %0 : vector<1x16x160xbf16> to vector<16x160xbf16>
    %c1 = arith.constant 1 : index
    %c0_2 = arith.constant 0 : index
    %c0_3 = arith.constant 0 : index
    %2 = vector.load %arg1[%c1, %c0_2, %c0_3] : memref<4x16x160xbf16, #tpu.memory_space<vmem>>, vector<1x16x160xbf16>
    %3 = vector.shape_cast %2 : vector<1x16x160xbf16> to vector<16x160xbf16>
    %c2 = arith.constant 2 : index
    %c0_4 = arith.constant 0 : index
    %c0_5 = arith.constant 0 : index
    %4 = vector.load %arg1[%c2, %c0_4, %c0_5] : memref<4x16x160xbf16, #tpu.memory_space<vmem>>, vector<1x16x160xbf16>
    %5 = vector.shape_cast %4 : vector<1x16x160xbf16> to vector<16x160xbf16>
    %c3 = arith.constant 3 : index
    %c0_6 = arith.constant 0 : index
    %c0_7 = arith.constant 0 : index
    %6 = vector.load %arg1[%c3, %c0_6, %c0_7] : memref<4x16x160xbf16, #tpu.memory_space<vmem>>, vector<1x16x160xbf16>
    %7 = vector.shape_cast %6 : vector<1x16x160xbf16> to vector<16x160xbf16>
    %8 = tpu.concatenate %1, %3, %5, %7 in 0 : vector<16x160xbf16>, vector<16x160xbf16>, vector<16x160xbf16>, vector<16x160xbf16> -> vector<64x160xbf16>
    %c0_8 = arith.constant 0 : index
    %c0_9 = arith.constant 0 : index
    %9 = vector.load %arg2[%c0_8, %c0_9] : memref<160x128xbf16, #tpu.memory_space<vmem>>, vector<160x128xbf16>
    %cst = arith.constant dense<0.000000e+00> : vector<64x128xf32>
    %10 = tpu.matmul %8, %9, %cst {dimension_numbers = #tpu.dot_dimension_numbers<[1], [0], [0], [1], [0, 0, 1, 1], [], []>} : vector<64x160xbf16>, vector<160x128xbf16>, vector<64x128xf32> -> vector<64x128xf32>
    %11 = vector.extract_strided_slice %10 {offsets = [0, 0], sizes = [16, 128], strides = [1, 1]} : vector<64x128xf32> to vector<16x128xf32>
    %12 = vector.extract_strided_slice %10 {offsets = [16, 0], sizes = [16, 128], strides = [1, 1]} : vector<64x128xf32> to vector<16x128xf32>
    %13 = arith.maximumf %11, %12 : vector<16x128xf32>
    %14 = vector.extract_strided_slice %10 {offsets = [32, 0], sizes = [16, 128], strides = [1, 1]} : vector<64x128xf32> to vector<16x128xf32>
    %15 = vector.extract_strided_slice %10 {offsets = [48, 0], sizes = [16, 128], strides = [1, 1]} : vector<64x128xf32> to vector<16x128xf32>
    %16 = arith.maximumf %14, %15 : vector<16x128xf32>
    %17 = arith.maximumf %13, %16 : vector<16x128xf32>
    %c0_10 = arith.constant 0 : index
    %c0_11 = arith.constant 0 : index
    %18 = vector.load %arg3[%c0_10, %c0_11] : memref<1x128xf32, #tpu.memory_space<vmem>>, vector<1x128xf32>
    %19 = vector.broadcast %18 : vector<1x128xf32> to vector<16x128xf32>
    %20 = arith.addf %17, %19 : vector<16x128xf32>
    %cst_12 = arith.constant 0.000000e+00 : f32
    %21 = vector.broadcast %cst_12 : f32 to vector<16x128xf32>
    %22 = arith.maximumf %20, %21 : vector<16x128xf32>
    %23 = arith.truncf %22 : vector<16x128xf32> to vector<16x128xbf16>
    %c0_13 = arith.constant 0 : index
    %c0_14 = arith.constant 0 : index
    %24 = vector.load %arg4[%c0_13, %c0_14] : memref<16x128xbf16, #tpu.memory_space<vmem>>, vector<16x128xbf16>
    tpu.vector_store %arg4[%c0_13, %c0_14], %23 {strides = array<i32>} : memref<16x128xbf16, #tpu.memory_space<vmem>>, vector<16x128xbf16>,
    return
  }
  func.func @transform_0(%arg0: i32) -> (i32, i32, i32) {
    %c0_i32 = arith.constant 0 : i32
    %c0_i32_0 = arith.constant 0 : i32
    %c0_i32_1 = arith.constant 0 : i32
    return %c0_i32, %arg0, %c0_i32_0 : i32, i32, i32
  }
  func.func @transform_1(%arg0: i32) -> (i32, i32) {
    %c0_i32 = arith.constant 0 : i32
    %c0_i32_0 = arith.constant 0 : i32
    %c0_i32_1 = arith.constant 0 : i32
    return %c0_i32, %c0_i32_0 : i32, i32
  }
  func.func @transform_2(%arg0: i32) -> (i32, i32) {
    %c0_i32 = arith.constant 0 : i32
    %c0_i32_0 = arith.constant 0 : i32
    %c0_i32_1 = arith.constant 0 : i32
    return %c0_i32, %c0_i32_0 : i32, i32
  }
  func.func @transform_3(%arg0: i32) -> (i32, i32) {
    %c0_i32 = arith.constant 0 : i32
    %c0_i32_0 = arith.constant 0 : i32
    return %arg0, %c0_i32 : i32, i32
  }
}

module attributes {stable_mosaic.version = 11 : i64} {
  func.func @_mlp_kernel(%arg0: i32, %arg1: memref<16x192xbf16, #tpu.memory_space<vmem>>, %arg2: memref<192x128xbf16, #tpu.memory_space<vmem>>, %arg3: memref<1x128xf32, #tpu.memory_space<vmem>>, %arg4: memref<128x128xbf16, #tpu.memory_space<vmem>>, %arg5: memref<1x128xf32, #tpu.memory_space<vmem>>, %arg6: memref<128x128xbf16, #tpu.memory_space<vmem>>, %arg7: memref<1x128xf32, #tpu.memory_space<vmem>>, %arg8: memref<16x128xf32, #tpu.memory_space<vmem>>) attributes {dimension_semantics = [#tpu.dimension_semantics<parallel>], iteration_bounds = array<i64: 1>, scalar_prefetch = 0 : i64, scratch_operands = 0 : i64, tpu.core_type = #tpu.core_type<tc>, window_params = [{transform_indices = @transform_0, window_bounds = array<i64: 16, 192>}, {pipeline_mode = #tpu.pipeline_mode<synchronous>, transform_indices = @transform_1, window_bounds = array<i64: 192, 128>}, {pipeline_mode = #tpu.pipeline_mode<synchronous>, transform_indices = @transform_2, window_bounds = array<i64: 1, 128>}, {pipeline_mode = #tpu.pipeline_mode<synchronous>, transform_indices = @transform_3, window_bounds = array<i64: 128, 128>}, {pipeline_mode = #tpu.pipeline_mode<synchronous>, transform_indices = @transform_4, window_bounds = array<i64: 1, 128>}, {pipeline_mode = #tpu.pipeline_mode<synchronous>, transform_indices = @transform_5, window_bounds = array<i64: 128, 128>}, {pipeline_mode = #tpu.pipeline_mode<synchronous>, transform_indices = @transform_6, window_bounds = array<i64: 1, 128>}, {transform_indices = @transform_7, window_bounds = array<i64: 16, 128>}]} {
    %c0 = arith.constant 0 : index
    %c0_0 = arith.constant 0 : index
    %0 = vector.load %arg1[%c0, %c0_0] : memref<16x192xbf16, #tpu.memory_space<vmem>>, vector<16x192xbf16>
    %c0_1 = arith.constant 0 : index
    %c0_2 = arith.constant 0 : index
    %1 = vector.load %arg2[%c0_1, %c0_2] : memref<192x128xbf16, #tpu.memory_space<vmem>>, vector<192x128xbf16>
    %cst = arith.constant dense<0.000000e+00> : vector<16x128xf32>
    %2 = tpu.matmul %0, %1, %cst {dimension_numbers = #tpu.dot_dimension_numbers<[1], [0], [0], [1], [0, 0, 1, 1], [], []>} : vector<16x192xbf16>, vector<192x128xbf16>, vector<16x128xf32> -> vector<16x128xf32>
    %c0_3 = arith.constant 0 : index
    %c0_4 = arith.constant 0 : index
    %3 = vector.load %arg3[%c0_3, %c0_4] : memref<1x128xf32, #tpu.memory_space<vmem>>, vector<1x128xf32>
    %4 = vector.broadcast %3 : vector<1x128xf32> to vector<16x128xf32>
    %5 = arith.addf %2, %4 : vector<16x128xf32>
    %cst_5 = arith.constant 0.000000e+00 : f32
    %6 = vector.broadcast %cst_5 : f32 to vector<16x128xf32>
    %7 = arith.maximumf %5, %6 : vector<16x128xf32>
    %8 = arith.truncf %7 : vector<16x128xf32> to vector<16x128xbf16>
    %c0_6 = arith.constant 0 : index
    %c0_7 = arith.constant 0 : index
    %9 = vector.load %arg4[%c0_6, %c0_7] : memref<128x128xbf16, #tpu.memory_space<vmem>>, vector<128x128xbf16>
    %cst_8 = arith.constant dense<0.000000e+00> : vector<16x128xf32>
    %10 = tpu.matmul %8, %9, %cst_8 {dimension_numbers = #tpu.dot_dimension_numbers<[1], [0], [0], [1], [0, 0, 1, 1], [], []>} : vector<16x128xbf16>, vector<128x128xbf16>, vector<16x128xf32> -> vector<16x128xf32>
    %c0_9 = arith.constant 0 : index
    %c0_10 = arith.constant 0 : index
    %11 = vector.load %arg5[%c0_9, %c0_10] : memref<1x128xf32, #tpu.memory_space<vmem>>, vector<1x128xf32>
    %12 = vector.broadcast %11 : vector<1x128xf32> to vector<16x128xf32>
    %13 = arith.addf %10, %12 : vector<16x128xf32>
    %cst_11 = arith.constant 0.000000e+00 : f32
    %14 = vector.broadcast %cst_11 : f32 to vector<16x128xf32>
    %15 = arith.maximumf %13, %14 : vector<16x128xf32>
    %16 = arith.truncf %15 : vector<16x128xf32> to vector<16x128xbf16>
    %c0_12 = arith.constant 0 : index
    %c0_13 = arith.constant 0 : index
    %17 = vector.load %arg6[%c0_12, %c0_13] : memref<128x128xbf16, #tpu.memory_space<vmem>>, vector<128x128xbf16>
    %cst_14 = arith.constant dense<0.000000e+00> : vector<16x128xf32>
    %18 = tpu.matmul %16, %17, %cst_14 {dimension_numbers = #tpu.dot_dimension_numbers<[1], [0], [0], [1], [0, 0, 1, 1], [], []>} : vector<16x128xbf16>, vector<128x128xbf16>, vector<16x128xf32> -> vector<16x128xf32>
    %c0_15 = arith.constant 0 : index
    %c0_16 = arith.constant 0 : index
    %19 = vector.load %arg7[%c0_15, %c0_16] : memref<1x128xf32, #tpu.memory_space<vmem>>, vector<1x128xf32>
    %20 = vector.broadcast %19 : vector<1x128xf32> to vector<16x128xf32>
    %21 = arith.addf %18, %20 : vector<16x128xf32>
    %c0_17 = arith.constant 0 : index
    %c0_18 = arith.constant 0 : index
    %22 = vector.load %arg8[%c0_17, %c0_18] : memref<16x128xf32, #tpu.memory_space<vmem>>, vector<16x128xf32>
    tpu.vector_store %arg8[%c0_17, %c0_18], %21 {strides = array<i32>} : memref<16x128xf32, #tpu.memory_space<vmem>>, vector<16x128xf32>,
    return
  }
  func.func @transform_0(%arg0: i32) -> (i32, i32) {
    %c0_i32 = arith.constant 0 : i32
    %c0_i32_0 = arith.constant 0 : i32
    return %arg0, %c0_i32 : i32, i32
  }
  func.func @transform_1(%arg0: i32) -> (i32, i32) {
    %c0_i32 = arith.constant 0 : i32
    %c0_i32_0 = arith.constant 0 : i32
    %c0_i32_1 = arith.constant 0 : i32
    return %c0_i32, %c0_i32_0 : i32, i32
  }
  func.func @transform_2(%arg0: i32) -> (i32, i32) {
    %c0_i32 = arith.constant 0 : i32
    %c0_i32_0 = arith.constant 0 : i32
    %c0_i32_1 = arith.constant 0 : i32
    return %c0_i32, %c0_i32_0 : i32, i32
  }
  func.func @transform_3(%arg0: i32) -> (i32, i32) {
    %c0_i32 = arith.constant 0 : i32
    %c0_i32_0 = arith.constant 0 : i32
    %c0_i32_1 = arith.constant 0 : i32
    return %c0_i32, %c0_i32_0 : i32, i32
  }
  func.func @transform_4(%arg0: i32) -> (i32, i32) {
    %c0_i32 = arith.constant 0 : i32
    %c0_i32_0 = arith.constant 0 : i32
    %c0_i32_1 = arith.constant 0 : i32
    return %c0_i32, %c0_i32_0 : i32, i32
  }
  func.func @transform_5(%arg0: i32) -> (i32, i32) {
    %c0_i32 = arith.constant 0 : i32
    %c0_i32_0 = arith.constant 0 : i32
    %c0_i32_1 = arith.constant 0 : i32
    return %c0_i32, %c0_i32_0 : i32, i32
  }
  func.func @transform_6(%arg0: i32) -> (i32, i32) {
    %c0_i32 = arith.constant 0 : i32
    %c0_i32_0 = arith.constant 0 : i32
    %c0_i32_1 = arith.constant 0 : i32
    return %c0_i32, %c0_i32_0 : i32, i32
  }
  func.func @transform_7(%arg0: i32) -> (i32, i32) {
    %c0_i32 = arith.constant 0 : i32
    %c0_i32_0 = arith.constant 0 : i32
    return %arg0, %c0_i32 : i32, i32
  }
}

</mosaic_0001>

<bundles_post_ra>
// kernel: network_forward.3
= control target key start
LH: loop header
LB: loop body
LE: loop exit
PB: predicated region body
PF: predicated region fallthrough
CT: control target
= control target key end

     0   :  { %s1906_s12 = smov 0   ;;  %s1908_s13 = smov 0   ;;  %s2238_s0 = inlined_call_operand.vmem [shape: bf16[4,288,32], index: 0, kind: input, shape index: {}]   ;;  %s2239_s1 = inlined_call_operand.vmem [shape: bf16[32,128], index: 1, kind: input, shape index: {}]   ;;  %s2240_s2 = inlined_call_operand.vmem [shape: f32[1,128], index: 2, kind: input, shape index: {}]   ;;  %s2241_s3 = inlined_call_operand.vmem [shape: bf16[288,128], index: 3, kind: output, shape index: {}]  }
   0x1   :  { %s1910_s14 = smov 0  }
   0x2 LB: > { %s1452_s15 = sadd.s32 4294967295, %s1884_s14   ;;  %s1923_s16 = sadd.s32 1, %s1884_s14   ;;  %s1884_s14 = sphi %s1910_s14, %s2244_s14   ;;  %s1880_s13 = sphi %s1908_s13, %s2243_s13   ;;  %s1876_s12 = sphi %s1906_s12, %s2242_s12  }
   0x3   : > { %s17_s17 = ssub.s32 %s1884_s14, %s1923_s16  ;;  %s20_s18 = sadd.s32 1, %s1880_s13 }
   0x4   : > { %p18_p0 = scmp.eq.s32.totalorder %s17_s17, 0  ;;  %p27_p1 = scmp.ne.s32.totalorder %s1880_s13, %s1876_s12 }
   0x5   : > { %p28_p2 = scmp.eq.s32.totalorder %s1884_s14, 0  ;;  %p1455_p4 = scmp.ge.s32.totalorder %s1884_s14, 2 }
   0x6   : > { %s1932_s19 = scalar_select %p18_p0, %s1880_s13, %s20_s18  }
   0x7   : > { %p29_p3 = por %p28_p2, %p27_p1  ;;  %127 = sbr.rel (%p1455_p4) target bundleno = 35 (0x23), region = 24 }
   0xc   : > { %130 = sbr.rel (!%p29_p3) target bundleno = 35 (0x23), region = 28  ;;  %s132_s20 = sand.u32 (%p29_p3), 1, %s1880_s13  }
   0xd   : > { %s1608_s21 = smul.u32 (%p29_p3), 72, %s1884_s14 }
   0xe   : > { %s1798_s22 = smul.u32 (%p29_p3), 288, %s132_s20 }
   0xf   : > { %s1940_s25 = scalar_lea.vmem (%p29_p3), %s2238_s0, %s1608_s21 }
  0x10   : > { %v154_v0 = vld [vmem:[%s1940_s25] sm:$0xff] (%p29_p3)   ;;  %v158_v1 = vld [vmem:[%s1940_s25 + $0x8] sm:$0xff] (%p29_p3)   ;;  %v162_v2 = vld [vmem:[%s1940_s25 + $0x10] sm:$0xff] (%p29_p3)   ;;  %s1945_s26 = scalar_lea.vmem (%p29_p3), [#allocation2], %s1798_s22 }
  0x11   : > { %155 = vst [vmem:[%s1945_s26] sm:$0xff] %v154_v0   ;;  %159 = vst [vmem:[%s1945_s26 + $0x8] sm:$0xff] %v158_v1   ;;  %v166_v3 = vld [vmem:[%s1940_s25 + $0x18] sm:$0xff]   ;;  %v170_v4 = vld [vmem:[%s1940_s25 + $0x20] sm:$0xff]  }
  0x12   : > { %163 = vst [vmem:[%s1945_s26 + $0x10] sm:$0xff] %v162_v2   ;;  %v174_v5 = vld [vmem:[%s1940_s25 + $0x28] sm:$0xff]   ;;  %167 = vst [vmem:[%s1945_s26 + $0x18] sm:$0xff] %v166_v3   ;;  %v178_v6 = vld [vmem:[%s1940_s25 + $0x30] sm:$0xff]  }
  0x13   : > { %171 = vst [vmem:[%s1945_s26 + $0x20] sm:$0xff] %v170_v4   ;;  %175 = vst [vmem:[%s1945_s26 + $0x28] sm:$0xff] %v174_v5   ;;  %v182_v7 = vld [vmem:[%s1940_s25 + $0x38] sm:$0xff]   ;;  %v186_v8 = vld [vmem:[%s1940_s25 + $0x40] sm:$0xff]  }
  0x14   : > { %179 = vst [vmem:[%s1945_s26 + $0x30] sm:$0xff] %v178_v6   ;;  %183 = vst [vmem:[%s1945_s26 + $0x38] sm:$0xff] %v182_v7   ;;  %v190_v9 = vld [vmem:[%s1940_s25 + $0x90] sm:$0xff]   ;;  %v194_v10 = vld [vmem:[%s1940_s25 + $0x98] sm:$0xff]  }
  0x15   : > { %187 = vst [vmem:[%s1945_s26 + $0x40] sm:$0xff] %v186_v8   ;;  %v198_v11 = vld [vmem:[%s1940_s25 + $0xa0] sm:$0xff]   ;;  %191 = vst [vmem:[%s1945_s26 + $0x48] sm:$0xff] %v190_v9   ;;  %v202_v12 = vld [vmem:[%s1940_s25 + $0xa8] sm:$0xff]  }
  0x16   : > { %195 = vst [vmem:[%s1945_s26 + $0x50] sm:$0xff] %v194_v10   ;;  %199 = vst [vmem:[%s1945_s26 + $0x58] sm:$0xff] %v198_v11   ;;  %v206_v13 = vld [vmem:[%s1940_s25 + $0xb0] sm:$0xff]   ;;  %v210_v14 = vld [vmem:[%s1940_s25 + $0xb8] sm:$0xff]  }
  0x17   : > { %203 = vst [vmem:[%s1945_s26 + $0x60] sm:$0xff] %v202_v12   ;;  %207 = vst [vmem:[%s1945_s26 + $0x68] sm:$0xff] %v206_v13   ;;  %v214_v15 = vld [vmem:[%s1940_s25 + $0xc0] sm:$0xff]   ;;  %v218_v16 = vld [vmem:[%s1940_s25 + $0xc8] sm:$0xff]  }
  0x18   : > { %211 = vst [vmem:[%s1945_s26 + $0x70] sm:$0xff] %v210_v14   ;;  %v222_v17 = vld [vmem:[%s1940_s25 + $0xd0] sm:$0xff]   ;;  %215 = vst [vmem:[%s1945_s26 + $0x78] sm:$0xff] %v214_v15   ;;  %v226_v18 = vld [vmem:[%s1940_s25 + $0x120] sm:$0xff]  }
  0x19   : > { %219 = vst [vmem:[%s1945_s26 + $0x80] sm:$0xff] %v218_v16   ;;  %223 = vst [vmem:[%s1945_s26 + $0x88] sm:$0xff] %v222_v17   ;;  %v230_v19 = vld [vmem:[%s1940_s25 + $0x128] sm:$0xff]   ;;  %v234_v20 = vld [vmem:[%s1940_s25 + $0x130] sm:$0xff]  }
  0x1a   : > { %227 = vst [vmem:[%s1945_s26 + $0x90] sm:$0xff] %v226_v18   ;;  %231 = vst [vmem:[%s1945_s26 + $0x98] sm:$0xff] %v230_v19   ;;  %v238_v21 = vld [vmem:[%s1940_s25 + $0x138] sm:$0xff]   ;;  %v242_v22 = vld [vmem:[%s1940_s25 + $0x140] sm:$0xff]  }
  0x1b   : > { %235 = vst [vmem:[%s1945_s26 + $0xa0] sm:$0xff] %v234_v20   ;;  %v246_v23 = vld [vmem:[%s1940_s25 + $0x148] sm:$0xff]   ;;  %239 = vst [vmem:[%s1945_s26 + $0xa8] sm:$0xff] %v238_v21   ;;  %v250_v24 = vld [vmem:[%s1940_s25 + $0x150] sm:$0xff]  }
  0x1c   : > { %243 = vst [vmem:[%s1945_s26 + $0xb0] sm:$0xff] %v242_v22   ;;  %247 = vst [vmem:[%s1945_s26 + $0xb8] sm:$0xff] %v246_v23   ;;  %v254_v25 = vld [vmem:[%s1940_s25 + $0x158] sm:$0xff]   ;;  %v258_v26 = vld [vmem:[%s1940_s25 + $0x160] sm:$0xff]  }
  0x1d   : > { %251 = vst [vmem:[%s1945_s26 + $0xc0] sm:$0xff] %v250_v24   ;;  %255 = vst [vmem:[%s1945_s26 + $0xc8] sm:$0xff] %v254_v25   ;;  %v262_v27 = vld [vmem:[%s1940_s25 + $0x1b0] sm:$0xff]   ;;  %v266_v28 = vld [vmem:[%s1940_s25 + $0x1b8] sm:$0xff]  }
  0x1e   : > { %259 = vst [vmem:[%s1945_s26 + $0xd0] sm:$0xff] %v258_v26   ;;  %v270_v29 = vld [vmem:[%s1940_s25 + $0x1c0] sm:$0xff]   ;;  %263 = vst [vmem:[%s1945_s26 + $0xd8] sm:$0xff] %v262_v27   ;;  %v274_v30 = vld [vmem:[%s1940_s25 + $0x1c8] sm:$0xff]  }
  0x1f   : > { %267 = vst [vmem:[%s1945_s26 + $0xe0] sm:$0xff] %v266_v28   ;;  %271 = vst [vmem:[%s1945_s26 + $0xe8] sm:$0xff] %v270_v29   ;;  %v278_v31 = vld [vmem:[%s1940_s25 + $0x1d0] sm:$0xff]   ;;  %v282_v32 = vld [vmem:[%s1940_s25 + $0x1d8] sm:$0xff]  }
  0x20   : > { %275 = vst [vmem:[%s1945_s26 + $0xf0] sm:$0xff] %v274_v30   ;;  %279 = vst [vmem:[%s1945_s26 + $0xf8] sm:$0xff] %v278_v31   ;;  %v286_v33 = vld [vmem:[%s1940_s25 + $0x1e0] sm:$0xff]   ;;  %v290_v34 = vld [vmem:[%s1940_s25 + $0x1e8] sm:$0xff]  }
  0x21   : > { %283 = vst [vmem:[%s1945_s26 + $0x100] sm:$0xff] %v282_v32   ;;  %v294_v35 = vld [vmem:[%s1940_s25 + $0x1f0] sm:$0xff]   ;;  %287 = vst [vmem:[%s1945_s26 + $0x108] sm:$0xff] %v286_v33  }
  0x22   : > { %291 = vst [vmem:[%s1945_s26 + $0x110] sm:$0xff] %v290_v34   ;;  %295 = vst [vmem:[%s1945_s26 + $0x118] sm:$0xff] %v294_v35  }
  0x23 PF: > { %p1457_p5 = scmp.ge.s32.totalorder %s1884_s14, 1  ;;  %p464_p6 = scmp.lt.s32.totalorder %s1884_s14, 3 }
  0x25   : > { %p465_p7 = pnand %p1457_p5, %p464_p6 }
  0x26   : > { %s471_s29 = sand.u32 (!%p465_p7), 1, %s1876_s12   ;;  %s495_s7 = smul.u32 (!%p465_p7), 18, %s1452_s15 }
  0x27   : > { %468 = sbr.rel (%p465_p7) target bundleno = 327 (0x147), region = 69 }
  0x28   : > { %s1799_s5 = smul.u32 (!%p465_p7), 288, %s471_s29  ;;  %p496_p8 = scmp.lt.s32.totalorder (!%p465_p7), %s495_s7, 35 }
  0x2a   : > { %s2025_s6 = scalar_lea.vmem (!%p465_p7), [#allocation2], %s1799_s5 }
  0x2c   : > { %v1824_v36 = vld [vmem:[%s2239_s1 + $0x8] sm:$0xff]   ;;  %v1825_v37 = vld [vmem:[%s2239_s1] sm:$0xff]   ;;  %vm773_vm0 = vcmask 261120   ;;  %v1827_v39 = vld [vmem:[%s2025_s6 + $0x90] sm:$0xff]   ;;  %s2246_s7 = smov (!%p496_p8, %s495_s7), 35 }
  0x2d   : > { %1718 = vmatprep.subr.bf16.mxu0 %v1824_v36  ;;  %1794 = vmatprep.subr.bf16.mxu1 %v1824_v36  ;;  %v1826_v38 = vld [vmem:[%s2025_s6] sm:$0xff]   ;;  %v1828_v40 = vld [vmem:[%s2025_s6 + $0x8] sm:$0xff]   ;;  %v1829_v41 = vld [vmem:[%s2025_s6 + $0x98] sm:$0xff]   ;;  %s1458_s10 = sshll.u32 %s2246_s7, 2 }
  0x2e   : > { %1719 = vmatpush3.bf16.msra.mxu0 %v1824_v36  ;;  %1796 = vmatpush3.bf16.msra.mxu1 %v1824_v36  ;;  %v1830_v42 = vld [vmem:[%s2025_s6 + $0x10] sm:$0xff]   ;;  %v1831_v43 = vld [vmem:[%s2025_s6 + $0xa0] sm:$0xff]   ;;  %v1832_v44 = vld [vmem:[%s2025_s6 + $0x18] sm:$0xff]   ;;  %s2173_s14 = scalar_lea.vmem %s2241_s3, %s1458_s10 }
  0x2f   : > { %1720 = vmatprep.subr.bf16.mxu0 %v1825_v37  ;;  %1795 = vmatprep.subr.bf16.mxu1 %v1825_v37  ;;  %v1833_v45 = vld [vmem:[%s2025_s6 + $0xa8] sm:$0xff]   ;;  %v1834_v46 = vld [vmem:[%s2025_s6 + $0x20] sm:$0xff]   ;;  %v1835_v47 = vld [vmem:[%s2025_s6 + $0xb0] sm:$0xff]  }
  0x30   : > { %1722 = vmatprep.mubr.msk.bf16.mxu0 %vm773_vm0, %v1826_v38  ;;  %1758 = vmatprep.mubr.msk.bf16.mxu1 %vm773_vm0, %v1827_v39  ;;  %v1836_v48 = vld [vmem:[%s2025_s6 + $0x28] sm:$0xff]   ;;  %v1837_v49 = vld [vmem:[%s2025_s6 + $0xb8] sm:$0xff]   ;;  %v1838_v50 = vld [vmem:[%s2025_s6 + $0x30] sm:$0xff]  }
  0x31   : > { %v1839_v51 = vld [vmem:[%s2025_s6 + $0xc0] sm:$0xff]   ;;  %v1840_v52 = vld [vmem:[%s2025_s6 + $0x38] sm:$0xff]   ;;  %v1841_v53 = vld [vmem:[%s2025_s6 + $0xc8] sm:$0xff]  }
  0x32   : > { %1721 = vmatpush3.bf16.msra.mxu0 %v1825_v37  ;;  %1797 = vmatpush3.bf16.msra.mxu1 %v1825_v37  ;;  %v1842_v54 = vld [vmem:[%s2025_s6 + $0x40] sm:$0xff]   ;;  %v1843_v55 = vld [vmem:[%s2025_s6 + $0xd0] sm:$0xff]   ;;  %v1844_v56 = vld [vmem:[%s2025_s6 + $0x48] sm:$0xff]  }
  0x33   : > { %v1845_v57 = vld [vmem:[%s2025_s6 + $0xd8] sm:$0xff]   ;;  %v1846_v58 = vld [vmem:[%s2025_s6 + $0x50] sm:$0xff]   ;;  %v1847_v59 = vld [vmem:[%s2025_s6 + $0xe0] sm:$0xff]  }
  0x34   : > { %v1848_v60 = vld [vmem:[%s2025_s6 + $0x58] sm:$0xff]   ;;  %v1849_v61 = vld [vmem:[%s2025_s6 + $0xe8] sm:$0xff]   ;;  %v1850_v62 = vld [vmem:[%s2025_s6 + $0x60] sm:$0xff]  }
  0x35   : > { %1723 = vmatmul.mubr.msk.bf16.vlgmr.msra.gmra.mxu0 %vm773_vm0, %v1828_v40  ;;  %1759 = vmatmul.mubr.msk.bf16.vlgmr.msra.gmra.mxu1 %vm773_vm0, %v1829_v41  ;;  %v1851_v63 = vld [vmem:[%s2025_s6 + $0xf0] sm:$0xff]   ;;  %v1852_v0 = vld [vmem:[%s2025_s6 + $0x68] sm:$0xff]   ;;  %v1853_v1 = vld [vmem:[%s2025_s6 + $0xf8] sm:$0xff]  }
  0x36   : > { %1726 = vmatprep.mubr.msk.bf16.mxu0 %vm773_vm0, %v1830_v42  ;;  %1762 = vmatprep.mubr.msk.bf16.mxu1 %vm773_vm0, %v1831_v43  ;;  %v1854_v2 = vld [vmem:[%s2025_s6 + $0x70] sm:$0xff]   ;;  %v1855_v3 = vld [vmem:[%s2025_s6 + $0x100] sm:$0xff]   ;;  %v1856_v4 = vld [vmem:[%s2025_s6 + $0x78] sm:$0xff]  }
  0x37   : > { %v1857_v5 = vld [vmem:[%s2025_s6 + $0x108] sm:$0xff]   ;;  %v1858_v6 = vld [vmem:[%s2025_s6 + $0x80] sm:$0xff]   ;;  %v1859_v7 = vld [vmem:[%s2025_s6 + $0x110] sm:$0xff]  }
  0x38   : > { %v1860_v8 = vld [vmem:[%s2025_s6 + $0x88] sm:$0xff]   ;;  %v1861_v9 = vld [vmem:[%s2025_s6 + $0x118] sm:$0xff]  }
  0x3d   : > { %1727 = vmatmul.mubr.msk.bf16.gmra.mxu0 %vm773_vm0, %v1832_v44  ;;  %1763 = vmatmul.mubr.msk.bf16.gmra.mxu1 %vm773_vm0, %v1833_v45 }
  0x3e   : > { %1730 = vmatprep.mubr.msk.bf16.mxu0 %vm773_vm0, %v1834_v46  ;;  %1766 = vmatprep.mubr.msk.bf16.mxu1 %vm773_vm0, %v1835_v47 }
  0x45   : > { %1731 = vmatmul.mubr.msk.bf16.gmra.mxu0 %vm773_vm0, %v1836_v48  ;;  %1767 = vmatmul.mubr.msk.bf16.gmra.mxu1 %vm773_vm0, %v1837_v49  ;;  %v2160_v49 = vld [vmem:[%s2240_s2] ss:$0 sm:$0xff] }
  0x46   : > { %1734 = vmatprep.mubr.msk.bf16.mxu0 %vm773_vm0, %v1838_v50  ;;  %1770 = vmatprep.mubr.msk.bf16.mxu1 %vm773_vm0, %v1839_v51 }
  0x4d   : > { %1735 = vmatmul.mubr.msk.bf16.gmra.mxu0 %vm773_vm0, %v1840_v52  ;;  %1771 = vmatmul.mubr.msk.bf16.gmra.mxu1 %vm773_vm0, %v1841_v53 }
  0x4e   : > { %1738 = vmatprep.mubr.msk.bf16.mxu0 %vm773_vm0, %v1842_v54  ;;  %1774 = vmatprep.mubr.msk.bf16.mxu1 %vm773_vm0, %v1843_v55 }
  0x55   : > { %1739 = vmatmul.mubr.msk.bf16.gmra.mxu0 %vm773_vm0, %v1844_v56  ;;  %1775 = vmatmul.mubr.msk.bf16.gmra.mxu1 %vm773_vm0, %v1845_v57 }
  0x56   : > { %1742 = vmatprep.mubr.msk.bf16.mxu0 %vm773_vm0, %v1846_v58  ;;  %1778 = vmatprep.mubr.msk.bf16.mxu1 %vm773_vm0, %v1847_v59 }
  0x5d   : > { %1743 = vmatmul.mubr.msk.bf16.gmra.mxu0 %vm773_vm0, %v1848_v60  ;;  %1779 = vmatmul.mubr.msk.bf16.gmra.mxu1 %vm773_vm0, %v1849_v61 }
  0x5e   : > { %1746 = vmatprep.mubr.msk.bf16.mxu0 %vm773_vm0, %v1850_v62  ;;  %1782 = vmatprep.mubr.msk.bf16.mxu1 %vm773_vm0, %v1851_v63 }
  0x65   : > { %1747 = vmatmul.mubr.msk.bf16.gmra.mxu0 %vm773_vm0, %v1852_v0  ;;  %1783 = vmatmul.mubr.msk.bf16.gmra.mxu1 %vm773_vm0, %v1853_v1 }
  0x66   : > { %1750 = vmatprep.mubr.msk.bf16.mxu0 %vm773_vm0, %v1854_v2  ;;  %1786 = vmatprep.mubr.msk.bf16.mxu1 %vm773_vm0, %v1855_v3 }
  0x6d   : > { %1751 = vmatmul.mubr.msk.bf16.gmra.mxu0 %vm773_vm0, %v1856_v4  ;;  %1787 = vmatmul.mubr.msk.bf16.gmra.mxu1 %vm773_vm0, %v1857_v5 }
  0x6e   : > { %1754 = vmatprep.mubr.msk.bf16.mxu0 %vm773_vm0, %v1858_v6  ;;  %1790 = vmatprep.mubr.msk.bf16.mxu1 %vm773_vm0, %v1859_v7 }
  0x75   : > { %1755 = vmatmul.mubr.msk.bf16.gmra.mxu0 %vm773_vm0, %v1860_v8  ;;  %1791 = vmatmul.mubr.msk.bf16.gmra.mxu1 %vm773_vm0, %v1861_v9 }
  0xf5   : > { %v2099_v10 = vpop.f32.mrf.mxu0  ;;  %v2101_v11 = vpop.f32.mrf.mxu1 }
  0xf7   : > { %v916_v12 = vpop.f32.mrf.mxu0  ;;  %v1060_v13 = vpop.f32.mrf.mxu1 }
  0xf9   : > { %v2103_v14 = vpop.f32.mrf.mxu0  ;;  %v2105_v15 = vpop.f32.mrf.mxu1 }
  0xfb   : > { %v919_v16 = vpop.f32.mrf.mxu0  ;;  %v1063_v17 = vpop.f32.mrf.mxu1 }
  0xfd   : > { %v2107_v18 = vpop.f32.mrf.mxu0  ;;  %v2109_v19 = vpop.f32.mrf.mxu1 }
  0xff   : > { %v932_v20 = vpop.f32.mrf.mxu0  ;;  %v1076_v21 = vpop.f32.mrf.mxu1 }
 0x101   : > { %v2111_v22 = vpop.f32.mrf.mxu0  ;;  %v2113_v23 = vpop.f32.mrf.mxu1 }
 0x103   : > { %v2115_v24 = vpop.f32.mrf.mxu0  ;;  %v2117_v25 = vpop.f32.mrf.mxu1 }
 0x105   : > { %v2119_v26 = vpop.f32.mrf.mxu0  ;;  %v2121_v27 = vpop.f32.mrf.mxu1 }
 0x107   : > { %v2123_v28 = vpop.f32.mrf.mxu0  ;;  %v2125_v29 = vpop.f32.mrf.mxu1 }
 0x109   : > { %v2127_v30 = vpop.f32.mrf.mxu0  ;;  %v2129_v31 = vpop.f32.mrf.mxu1 }
 0x10b   : > { %v2131_v32 = vpop.f32.mrf.mxu0  ;;  %v2133_v33 = vpop.f32.mrf.mxu1 }
 0x10d   : > { %v2135_v34 = vpop.f32.mrf.mxu0  ;;  %v2137_v35 = vpop.f32.mrf.mxu1 }
 0x10f   : > { %v2139_v36 = vpop.f32.mrf.mxu0  ;;  %v2141_v37 = vpop.f32.mrf.mxu1 }
 0x111   : > { %v2143_v38 = vpop.f32.mrf.mxu0  ;;  %v2145_v39 = vpop.f32.mrf.mxu1 }
 0x113   : > { %v2149_v40 = vpop.f32.mrf.mxu0  ;;  %v2151_v41 = vpop.f32.mrf.mxu1 }
 0x115   : > { %v1740_v42 = vpop.f32.mrf.mxu0  ;;  %v1776_v43 = vpop.f32.mrf.mxu1 }
 0x116   : > { %v1203_v44 = vmax.f32 %v916_v12, %v1740_v42  ;;  %v1221_v45 = vmax.f32 %v1060_v13, %v1776_v43 }
 0x117   : > { %v2153_v46 = vpop.f32.mrf.mxu0  ;;  %v2155_v47 = vpop.f32.mrf.mxu1 }
 0x118   : > { %v1239_v48 = vmax.f32 %v1203_v44, %v1221_v45 }
 0x119   : > { %v1741_v50 = vpop.f32.mrf.mxu0  ;;  %v1777_v51 = vpop.f32.mrf.mxu1 }
 0x11a   : > { %v1204_v52 = vmax.f32 %v919_v16, %v1741_v50  ;;  %v1222_v53 = vmax.f32 %v1063_v17, %v1777_v51  ;;  %v1264_v56 = vadd.f32 %v2160_v49, %v1239_v48 }
 0x11b   : > { %v2162_v54 = vpop.f32.mrf.mxu0  ;;  %v2164_v55 = vpop.f32.mrf.mxu1 }
 0x11c   : > { %v1240_v57 = vmax.f32 %v1204_v52, %v1222_v53  ;;  %v1282_v1 = vmax.f32 %v1264_v56, 0.0 }
 0x11d   : > { %v1744_v58 = vpop.f32.mrf.mxu0  ;;  %v1780_v59 = vpop.f32.mrf.mxu1 }
 0x11e   : > { %v1265_v60 = vadd.f32 %v2160_v49, %v1240_v57  ;;  %v1207_v61 = vmax.f32 %v932_v20, %v1744_v58  ;;  %v1225_v62 = vmax.f32 %v1076_v21, %v1780_v59 }
 0x11f   : > { %v996_v63 = vpop.f32.mrf.mxu0  ;;  %v1140_v0 = vpop.f32.mrf.mxu1 }
 0x120   : > { %v1283_v2 = vmax.f32 %v1265_v60, 0.0  ;;  %v1205_v3 = vmax.f32 %v2099_v10, %v996_v63  ;;  %v1223_v4 = vmax.f32 %v2101_v11, %v1140_v0  ;;  %v1243_v5 = vmax.f32 %v1207_v61, %v1225_v62 }
 0x121   : > { %v1745_v6 = vpop.f32.mrf.mxu0  ;;  %v1781_v7 = vpop.f32.mrf.mxu1 }
 0x122   : > { %v1630_v8 = vpack.c.bf16 %v1283_v2, %v1282_v1  ;;  %v1241_v9 = vmax.f32 %v1205_v3, %v1223_v4  ;;  %v1208_v12 = vmax.f32 %v2115_v24, %v1745_v6  ;;  %v1226_v13 = vmax.f32 %v2117_v25, %v1781_v7 }
 0x123   : > { %v999_v16 = vpop.f32.mrf.mxu0  ;;  %v1143_v17 = vpop.f32.mrf.mxu1  ;;  %v1268_v20 = vadd.f32 %v2160_v49, %v1243_v5 }
 0x124   : > { %1631 = vst [vmem:[%s2173_s14] sm:$0xff] %v1630_v8   ;;  %v1206_v10 = vmax.f32 %v2103_v14, %v999_v16  ;;  %v1224_v11 = vmax.f32 %v2105_v15, %v1143_v17  ;;  %v1244_v21 = vmax.f32 %v1208_v12, %v1226_v13  ;;  %v1266_v44 = vadd.f32 %v2160_v49, %v1241_v9 }
 0x125   : > { %v1748_v42 = vpop.f32.mrf.mxu0  ;;  %v1784_v43 = vpop.f32.mrf.mxu1  ;;  %v1286_v53 = vmax.f32 %v1268_v20, 0.0 }
 0x126   : > { %v1242_v45 = vmax.f32 %v1206_v10, %v1224_v11  ;;  %v1211_v48 = vmax.f32 %v2123_v28, %v1748_v42  ;;  %v1229_v24 = vmax.f32 %v2125_v29, %v1784_v43  ;;  %v1269_v25 = vadd.f32 %v2160_v49, %v1244_v21 }
 0x127   : > { %v1012_v50 = vpop.f32.mrf.mxu0  ;;  %v1156_v51 = vpop.f32.mrf.mxu1  ;;  %v1284_v60 = vmax.f32 %v1266_v44, 0.0 }
 0x128   : > { %v1267_v14 = vadd.f32 %v2160_v49, %v1242_v45  ;;  %v1209_v15 = vmax.f32 %v2107_v18, %v1012_v50  ;;  %v1227_v52 = vmax.f32 %v2109_v19, %v1156_v51  ;;  %v1287_v56 = vmax.f32 %v1269_v25, 0.0 }
 0x129   : > { %v1247_v57 = vmax.f32 %v1211_v48, %v1229_v24  ;;  %v1749_v58 = vpop.f32.mrf.mxu0  ;;  %v1785_v59 = vpop.f32.mrf.mxu1 }
 0x12a   : > { %v1285_v28 = vmax.f32 %v1267_v14, 0.0  ;;  %v1212_v29 = vmax.f32 %v2131_v32, %v1749_v58  ;;  %v1640_v61 = vpack.c.bf16 %v1287_v56, %v1286_v53  ;;  %v1245_v62 = vmax.f32 %v1209_v15, %v1227_v52 }
 0x12b   : > { %v1230_v63 = vmax.f32 %v2133_v33, %v1785_v59  ;;  %v1015_v0 = vpop.f32.mrf.mxu0  ;;  %v1159_v1 = vpop.f32.mrf.mxu1  ;;  %v1272_v2 = vadd.f32 %v2160_v49, %v1247_v57 }
 0x12c   : > { %v1635_v18 = vpack.c.bf16 %v1285_v28, %v1284_v60  ;;  %v1210_v19 = vmax.f32 %v2111_v22, %v1015_v0  ;;  %1673 = vst [vmem:[%s2173_s14 + $0x10] sm:$0xff] %v1640_v61   ;;  %v1228_v4 = vmax.f32 %v2113_v23, %v1159_v1  ;;  %v1270_v33 = vadd.f32 %v2160_v49, %v1245_v62 }
 0x12d   : > { %v1248_v3 = vmax.f32 %v1212_v29, %v1230_v63  ;;  %v1752_v5 = vpop.f32.mrf.mxu0  ;;  %v1788_v6 = vpop.f32.mrf.mxu1  ;;  %v1290_v23 = vmax.f32 %v1272_v2, 0.0 }
 0x12e   : > { %1672 = vst [vmem:[%s2173_s14 + $0x8] sm:$0xff] %v1635_v18   ;;  %v1215_v32 = vmax.f32 %v2139_v36, %v1752_v5  ;;  %v1233_v7 = vmax.f32 %v2141_v37, %v1788_v6  ;;  %v1246_v9 = vmax.f32 %v1210_v19, %v1228_v4  ;;  %v1288_v42 = vmax.f32 %v1270_v33, 0.0 }
 0x12f   : > { %v1273_v8 = vadd.f32 %v2160_v49, %v1248_v3  ;;  %v1028_v12 = vpop.f32.mrf.mxu0  ;;  %v1172_v22 = vpop.f32.mrf.mxu1 }
 0x130   : > { %v1251_v13 = vmax.f32 %v1215_v32, %v1233_v7  ;;  %v1213_v16 = vmax.f32 %v2119_v26, %v1028_v12  ;;  %v1231_v17 = vmax.f32 %v2121_v27, %v1172_v22  ;;  %v1271_v11 = vadd.f32 %v2160_v49, %v1246_v9 }
 0x131   : > { %v1291_v10 = vmax.f32 %v1273_v8, 0.0  ;;  %v1753_v36 = vpop.f32.mrf.mxu0  ;;  %v1789_v20 = vpop.f32.mrf.mxu1 }
 0x132   : > { %v1216_v37 = vmax.f32 %v2149_v40, %v1753_v36  ;;  %v1234_v21 = vmax.f32 %v2151_v41, %v1789_v20  ;;  %v1289_v44 = vmax.f32 %v1271_v11, 0.0  ;;  %v1249_v45 = vmax.f32 %v1213_v16, %v1231_v17 }
 0x133   : > { %v1650_v43 = vpack.c.bf16 %v1291_v10, %v1290_v23  ;;  %v1031_v48 = vpop.f32.mrf.mxu0  ;;  %v1175_v26 = vpop.f32.mrf.mxu1  ;;  %v1276_v27 = vadd.f32 %v2160_v49, %v1251_v13 }
 0x134   : > { %v1252_v24 = vmax.f32 %v1216_v37, %v1234_v21  ;;  %v1214_v25 = vmax.f32 %v2127_v30, %v1031_v48  ;;  %v1645_v50 = vpack.c.bf16 %v1289_v44, %v1288_v42  ;;  %v1232_v51 = vmax.f32 %v2129_v31, %v1175_v26 }
 0x135   : > { %1675 = vst [vmem:[%s2173_s14 + $0x20] sm:$0xff] %v1650_v43   ;;  %v1756_v14 = vpop.f32.mrf.mxu0  ;;  %v1792_v40 = vpop.f32.mrf.mxu1  ;;  %v1274_v53 = vadd.f32 %v2160_v49, %v1249_v45  ;;  %v1294_v59 = vmax.f32 %v1276_v27, 0.0 }
 0x136   : > { %v1277_v41 = vadd.f32 %v2160_v49, %v1252_v24  ;;  %v1219_v15 = vmax.f32 %v2153_v46, %v1756_v14  ;;  %v1237_v52 = vmax.f32 %v2155_v47, %v1792_v40  ;;  %1674 = vst [vmem:[%s2173_s14 + $0x18] sm:$0xff] %v1645_v50   ;;  %v1250_v56 = vmax.f32 %v1214_v25, %v1232_v51 }
 0x137   : > { %v1044_v57 = vpop.f32.mrf.mxu0  ;;  %v1188_v58 = vpop.f32.mrf.mxu1  ;;  %v1292_v0 = vmax.f32 %v1274_v53, 0.0 }
 0x138   : > { %v1295_v30 = vmax.f32 %v1277_v41, 0.0  ;;  %v1217_v60 = vmax.f32 %v2135_v34, %v1044_v57  ;;  %v1235_v31 = vmax.f32 %v2137_v35, %v1188_v58  ;;  %v1275_v28 = vadd.f32 %v2160_v49, %v1250_v56 }
 0x139   : > { %v1255_v29 = vmax.f32 %v1219_v15, %v1237_v52  ;;  %v1757_v61 = vpop.f32.mrf.mxu0  ;;  %v1793_v46 = vpop.f32.mrf.mxu1 }
 0x13a   : > { %v1660_v62 = vpack.c.bf16 %v1295_v30, %v1294_v59  ;;  %v1253_v47 = vmax.f32 %v1217_v60, %v1235_v31  ;;  %v1220_v63 = vmax.f32 %v2162_v54, %v1757_v61  ;;  %v1293_v1 = vmax.f32 %v1275_v28, 0.0 }
 0x13b   : > { %v1238_v18 = vmax.f32 %v2164_v55, %v1793_v46  ;;  %v1047_v19 = vpop.f32.mrf.mxu0  ;;  %v1191_v2 = vpop.f32.mrf.mxu1  ;;  %v1280_v4 = vadd.f32 %v2160_v49, %v1255_v29 }
 0x13c   : > { %1677 = vst [vmem:[%s2173_s14 + $0x30] sm:$0xff] %v1660_v62   ;;  %v1218_v34 = vmax.f32 %v2143_v38, %v1047_v19  ;;  %v1236_v35 = vmax.f32 %v2145_v39, %v1191_v2  ;;  %v1655_v3 = vpack.c.bf16 %v1293_v1, %v1292_v0  ;;  %v1278_v6 = vadd.f32 %v2160_v49, %v1253_v47 }
 0x13d   : > { %v1256_v5 = vmax.f32 %v1220_v63, %v1238_v18  ;;  %v1298_v7 = vmax.f32 %v1280_v4, 0.0 }
 0x13e   : > { %v1254_v54 = vmax.f32 %v1218_v34, %v1236_v35  ;;  %1676 = vst [vmem:[%s2173_s14 + $0x28] sm:$0xff] %v1655_v3   ;;  %v1296_v8 = vmax.f32 %v1278_v6, 0.0 }
 0x13f   : > { %v1281_v32 = vadd.f32 %v2160_v49, %v1256_v5 }
 0x140   : > { %v1279_v55 = vadd.f32 %v2160_v49, %v1254_v54 }
 0x141   : > { %v1299_v33 = vmax.f32 %v1281_v32, 0.0 }
 0x142   : > { %v1297_v38 = vmax.f32 %v1279_v55, 0.0 }
 0x143   : > { %v1670_v9 = vpack.c.bf16 %v1299_v33, %v1298_v7 }
 0x144   : > { %v1665_v12 = vpack.c.bf16 %v1297_v38, %v1296_v8 }
 0x145   : > { %1679 = vst [vmem:[%s2173_s14 + $0x40] sm:$0xff] %v1670_v9  }
 0x146   : > { %1678 = vst [vmem:[%s2173_s14 + $0x38] sm:$0xff] %v1665_v12  }
 0x147 PF: > { %p10_p9 = scmp.ge.s32.totalorder %s1923_s16, 4   ;;  %s2242_s12 = smov %s1880_s13 }
 0x148   : > { %s2243_s13 = smov %s1932_s19  ;;  %s2244_s14 = smov %s1923_s16 }
 0x149   :  { %12 = sbr.rel (!%p10_p9) target bundleno = 2 (0x2), region = 111 }

// kernel: network_forward.4
= control target key start
LH: loop header
LB: loop body
LE: loop exit
PB: predicated region body
PF: predicated region fallthrough
CT: control target
= control target key end

     0   :  { %s699_s12 = smov 0   ;;  %s701_s13 = smov 0   ;;  %s798_s0 = inlined_call_operand.vmem [shape: bf16[4,32,160], index: 0, kind: input, shape index: {}]   ;;  %s799_s1 = inlined_call_operand.vmem [shape: bf16[160,128], index: 1, kind: input, shape index: {}]   ;;  %s800_s2 = inlined_call_operand.vmem [shape: f32[1,128], index: 2, kind: input, shape index: {}]   ;;  %s801_s3 = inlined_call_operand.vmem [shape: bf16[32,128], index: 3, kind: output, shape index: {}]  }
   0x1   :  { %s703_s14 = smov 0  }
   0x2 LB: > { %s533_s15 = sadd.s32 4294967295, %s676_s14   ;;  %s716_s16 = sadd.s32 1, %s676_s14   ;;  %s676_s14 = sphi %s703_s14, %s804_s14   ;;  %s672_s13 = sphi %s701_s13, %s803_s13   ;;  %s668_s12 = sphi %s699_s12, %s802_s12  }
   0x3   : > { %s17_s17 = ssub.s32 %s676_s14, %s716_s16  ;;  %s20_s18 = sadd.s32 1, %s672_s13 }
   0x4   : > { %p18_p0 = scmp.eq.s32.totalorder %s17_s17, 0  ;;  %p27_p1 = scmp.ne.s32.totalorder %s672_s13, %s668_s12 }
   0x5   : > { %p28_p2 = scmp.eq.s32.totalorder %s676_s14, 0  ;;  %p536_p4 = scmp.ge.s32.totalorder %s676_s14, 2 }
   0x6   : > { %s725_s19 = scalar_select %p18_p0, %s672_s13, %s20_s18  }
   0x7   : > { %p29_p3 = por %p28_p2, %p27_p1  ;;  %127 = sbr.rel (%p536_p4) target bundleno = 20 (0x14), region = 24 }
   0xc   : > { %130 = sbr.rel (!%p29_p3) target bundleno = 20 (0x14), region = 28  ;;  %s132_s20 = sand.u32 (%p29_p3), 1, %s672_s13  }
   0xd   : > { %s579_s21 = sshll.u32 (%p29_p3), %s676_s14, 4  ;;  %s537_s22 = sshll.u32 (%p29_p3), %s132_s20, 6 }
   0xe   : > { %s138_s25 = scalar_lea.vmem (%p29_p3), %s798_s0, %s579_s21  ;;  %s134_s26 = scalar_lea.vmem (%p29_p3), [#allocation2], %s537_s22 }
   0xf   : > { %v181_v0 = vld [vmem:[%s138_s25] sm:$0xff] (%p29_p3)  ;;  %v183_v1 = vld [vmem:[%s138_s25 + $0x8] sm:$0xff] (%p29_p3) }
  0x10   : > { %v185_v2 = vld [vmem:[%s138_s25 + $0x20] sm:$0xff] (%p29_p3)  ;;  %182 = vst [vmem:[%s134_s26] sm:$0xff] (%p29_p3), %v181_v0  ;;  %184 = vst [vmem:[%s134_s26 + $0x8] sm:$0xff] (%p29_p3), %v183_v1  ;;  %v187_v3 = vld [vmem:[%s138_s25 + $0x28] sm:$0xff] (%p29_p3) }
  0x11   : > { %186 = vst [vmem:[%s134_s26 + $0x10] sm:$0xff] %v185_v2  ;;  %v189_v4 = vld [vmem:[%s138_s25 + $0x40] sm:$0xff]  ;;  %v191_v5 = vld [vmem:[%s138_s25 + $0x48] sm:$0xff]  ;;  %188 = vst [vmem:[%s134_s26 + $0x18] sm:$0xff] %v187_v3 }
  0x12   : > { %190 = vst [vmem:[%s134_s26 + $0x20] sm:$0xff] %v189_v4  ;;  %192 = vst [vmem:[%s134_s26 + $0x28] sm:$0xff] %v191_v5  ;;  %v193_v6 = vld [vmem:[%s138_s25 + $0x60] sm:$0xff]  ;;  %v195_v7 = vld [vmem:[%s138_s25 + $0x68] sm:$0xff] }
  0x13   : > { %194 = vst [vmem:[%s134_s26 + $0x30] sm:$0xff] %v193_v6  ;;  %196 = vst [vmem:[%s134_s26 + $0x38] sm:$0xff] %v195_v7 }
  0x14 PF: > { %p541_p5 = scmp.ge.s32.totalorder %s676_s14, 1  ;;  %p201_p6 = scmp.lt.s32.totalorder %s676_s14, 3 }
  0x16   : > { %p202_p7 = pnand %p541_p5, %p201_p6 }
  0x17   : > { %s208_s4 = sand.u32 (!%p202_p7), 1, %s668_s12   ;;  %s543_s28 = sshll.u32 (!%p202_p7), %s533_s15, 1 }
  0x18   : > { %205 = sbr.rel (%p202_p7) target bundleno = 286 (0x11e), region = 66  ;;  %s542_s5 = sshll.u32 (!%p202_p7), %s208_s4, 6 }
  0x19   : > { %s748_s10 = scalar_lea.vmem (!%p202_p7), [#allocation2], %s542_s5  ;;  %p233_p8 = scmp.lt.s32.totalorder (!%p202_p7), %s543_s28, 3 }
  0x1d   : > { %v632_v8 = vld [vmem:[%s799_s1 + $0x38] sm:$0xff]   ;;  %v678_v9 = vmov 0   ;;  %v633_v10 = vld [vmem:[%s799_s1 + $0x30] sm:$0xff]   ;;  %v634_v11 = vld [vmem:[%s799_s1 + $0x28] sm:$0xff]   ;;  %vm366_vm0 = vcmask 261120   ;;  %s806_s28 = smov (!%p233_p8, %s543_s28), 3 }
  0x1e   : > { %379 = vmatprep.subr.bf16.mxu0 %v678_v9  ;;  %587 = vmatprep.subr.bf16.mxu1 %v678_v9  ;;  %v635_v12 = vld [vmem:[%s799_s1 + $0x20] sm:$0xff]   ;;  %v636_v15 = vld [vmem:[%s799_s1 + $0x18] sm:$0xff]   ;;  %v637_v16 = vld [vmem:[%s799_s1 + $0x10] sm:$0xff]   ;;  %s544_s14 = sshll.u32 %s806_s28, 2 }
  0x1f   : > { %380 = vmatpush1.bf16.msra.mxu0 %v632_v8  ;;  %597 = vmatpush1.bf16.msra.mxu1 %v632_v8  ;;  %v644_v13 = vld [vmem:[%s748_s10 + $0x4] ss:$8 sps:$4 sm:$0xff]   ;;  %v642_v21 = vld [vmem:[%s748_s10] ss:$8 sps:$4 sm:$0xff]   ;;  %v648_v23 = vld [vmem:[%s748_s10 + $0x14] ss:$8 sps:$4 sm:$0xff]   ;;  %s236_s5 = scalar_lea.vmem %s801_s3, %s544_s14 }
  0x20   : > { %381 = vmatprep.subr.bf16.mxu0 %v678_v9  ;;  %588 = vmatprep.subr.bf16.mxu1 %v678_v9  ;;  %v647_v14 = vld [vmem:[%s748_s10 + $0x24] ss:$8 sps:$4 sm:$0xff]   ;;  %v645_v22 = vld [vmem:[%s748_s10 + $0x20] ss:$8 sps:$4 sm:$0xff]   ;;  %v650_v24 = vld [vmem:[%s748_s10 + $0x34] ss:$8 sps:$4 sm:$0xff]  }
  0x21   : > { %569 = vmatprep.mubr.msk.bf16.mxu0 %vm366_vm0, %v644_v13  ;;  %571 = vmatprep.mubr.msk.bf16.mxu1 %vm366_vm0, %v647_v14  ;;  %v638_v17 = vld [vmem:[%s799_s1 + $0x8] sm:$0xff]   ;;  %v639_v18 = vld [vmem:[%s799_s1] sm:$0xff]   ;;  %v652_v25 = vld [vmem:[%s748_s10 + $0x10] ss:$8 sps:$4 sm:$0xff]  }
  0x22   : > { %v640_v19 = vld [vmem:[%s799_s1 + $0x48] sm:$0xff]   ;;  %v641_v20 = vld [vmem:[%s799_s1 + $0x40] sm:$0xff]   ;;  %v653_v26 = vld [vmem:[%s748_s10 + $0x30] ss:$8 sps:$4 sm:$0xff]  }
  0x23   : > { %382 = vmatpush1.bf16.msra.mxu0 %v633_v10  ;;  %598 = vmatpush1.bf16.msra.mxu1 %v633_v10  ;;  %v573_v42 = vld [vmem:[%s800_s2] ss:$0 sm:$0xff] }
  0x24   : > { %383 = vmatprep.subr.bf16.mxu0 %v678_v9  ;;  %589 = vmatprep.subr.bf16.mxu1 %v678_v9 }
  0x27   : > { %384 = vmatpush1.bf16.msra.mxu0 %v634_v11  ;;  %599 = vmatpush1.bf16.msra.mxu1 %v634_v11 }
  0x28   : > { %385 = vmatprep.subr.bf16.mxu0 %v678_v9  ;;  %590 = vmatprep.subr.bf16.mxu1 %v678_v9 }
  0x2b   : > { %386 = vmatpush1.bf16.msra.mxu0 %v635_v12  ;;  %600 = vmatpush1.bf16.msra.mxu1 %v635_v12 }
  0x2c   : > { %387 = vmatprep.subr.bf16.mxu0 %v678_v9  ;;  %591 = vmatprep.subr.bf16.mxu1 %v678_v9 }
  0x2f   : > { %388 = vmatpush1.bf16.msra.mxu0 %v636_v15  ;;  %601 = vmatpush1.bf16.msra.mxu1 %v636_v15 }
  0x30   : > { %389 = vmatprep.subr.bf16.mxu0 %v678_v9  ;;  %592 = vmatprep.subr.bf16.mxu1 %v678_v9 }
  0x33   : > { %390 = vmatpush1.bf16.msra.mxu0 %v637_v16  ;;  %602 = vmatpush1.bf16.msra.mxu1 %v637_v16 }
  0x34   : > { %391 = vmatprep.subr.bf16.mxu0 %v678_v9  ;;  %593 = vmatprep.subr.bf16.mxu1 %v678_v9 }
  0x37   : > { %392 = vmatpush1.bf16.msra.mxu0 %v638_v17  ;;  %603 = vmatpush1.bf16.msra.mxu1 %v638_v17 }
  0x38   : > { %393 = vmatprep.subr.bf16.mxu0 %v678_v9  ;;  %594 = vmatprep.subr.bf16.mxu1 %v678_v9 }
  0x3b   : > { %394 = vmatpush1.bf16.msra.mxu0 %v639_v18  ;;  %604 = vmatpush1.bf16.msra.mxu1 %v639_v18 }
  0x3c   : > { %407 = vmatprep.subr.bf16.mxu0 %v678_v9  ;;  %595 = vmatprep.subr.bf16.mxu1 %v678_v9 }
  0x3f   : > { %408 = vmatpush2.bf16.msra.mxu0 %v640_v19  ;;  %605 = vmatpush2.bf16.msra.mxu1 %v640_v19 }
  0x40   : > { %409 = vmatprep.subr.bf16.mxu0 %v678_v9  ;;  %596 = vmatprep.subr.bf16.mxu1 %v678_v9 }
  0x43   : > { %410 = vmatpush2.bf16.msra.mxu0 %v641_v20  ;;  %606 = vmatpush2.bf16.msra.mxu1 %v641_v20 }
  0x46   : > { %412 = vmatmul.mubr.bf16.vlgmr.msra.gmra.mxu0 %v642_v21  ;;  %428 = vmatmul.mubr.bf16.vlgmr.msra.gmra.mxu1 %v645_v22 }
  0x47   : > { %570 = vmatprep.mubr.msk.bf16.mxu0 %vm366_vm0, %v648_v23  ;;  %572 = vmatprep.mubr.msk.bf16.mxu1 %vm366_vm0, %v650_v24 }
  0x4e   : > { %420 = vmatmul.mubr.bf16.gmra.mxu0 %v652_v25  ;;  %436 = vmatmul.mubr.bf16.gmra.mxu1 %v653_v26 }
 0x106   : > { %v413_v27 = vpop.f32.mrf.mxu0  ;;  %v429_v28 = vpop.f32.mrf.mxu1 }
 0x108   : > { %v415_v29 = vpop.f32.mrf.mxu0  ;;  %v431_v30 = vpop.f32.mrf.mxu1 }
 0x10a   : > { %v416_v31 = vpop.f32.mrf.mxu0  ;;  %v432_v32 = vpop.f32.mrf.mxu1 }
 0x10c   : > { %v418_v33 = vpop.f32.mrf.mxu0  ;;  %v434_v34 = vpop.f32.mrf.mxu1 }
 0x10e   : > { %v421_v35 = vpop.f32.mrf.mxu0  ;;  %v437_v36 = vpop.f32.mrf.mxu1 }
 0x10f   : > { %v444_v37 = vmax.f32 %v413_v27, %v421_v35  ;;  %v446_v38 = vmax.f32 %v429_v28, %v437_v36 }
 0x110   : > { %v423_v39 = vpop.f32.mrf.mxu0  ;;  %v439_v40 = vpop.f32.mrf.mxu1 }
 0x111   : > { %v448_v41 = vmax.f32 %v444_v37, %v446_v38 }
 0x112   : > { %v424_v43 = vpop.f32.mrf.mxu0  ;;  %v440_v44 = vpop.f32.mrf.mxu1 }
 0x113   : > { %v445_v45 = vmax.f32 %v416_v31, %v424_v43  ;;  %v447_v46 = vmax.f32 %v432_v32, %v440_v44  ;;  %v457_v49 = vadd.f32 %v573_v42, %v448_v41 }
 0x114   : > { %v426_v47 = vpop.f32.mrf.mxu0  ;;  %v442_v48 = vpop.f32.mrf.mxu1 }
 0x115   : > { %v449_v50 = vmax.f32 %v445_v45, %v447_v46  ;;  %v459_v52 = vmax.f32 %v457_v49, 0.0 }
 0x117   : > { %v458_v51 = vadd.f32 %v573_v42, %v449_v50 }
 0x119   : > { %v460_v53 = vmax.f32 %v458_v51, 0.0 }
 0x11b   : > { %v585_v54 = vpack.c.bf16 %v460_v53, %v459_v52 }
 0x11d   : > { %586 = vst [vmem:[%s236_s5] sm:$0xff] %v585_v54  }
 0x11e PF: > { %p10_p9 = scmp.ge.s32.totalorder %s716_s16, 4   ;;  %s802_s12 = smov %s672_s13 }
 0x11f   : > { %s803_s13 = smov %s725_s19  ;;  %s804_s14 = smov %s716_s16 }
 0x120   :  { %12 = sbr.rel (!%p10_p9) target bundleno = 2 (0x2), region = 108 }

// kernel: network_forward.5
= control target key start
LH: loop header
LB: loop body
LE: loop exit
PB: predicated region body
PF: predicated region fallthrough
CT: control target
= control target key end

     0   :  { %v548_v0 = vmov 0   ;;  %v549_v2 = vmov 0.0   ;;  %vm141_vm0 = vcmask 523264   ;;  %vm550_vm1 = vmmov 0   ;;  %s716_s1 = inlined_call_operand.vmem [shape: bf16[192,128], index: 1, kind: input, shape index: {}]   ;;  %s717_s0 = inlined_call_operand.vmem [shape: bf16[16,192], index: 0, kind: input, shape index: {}]   ;;  %s718_s3 = inlined_call_operand.vmem [shape: bf16[128,128], index: 3, kind: input, shape index: {}]   ;;  %s719_s5 = inlined_call_operand.vmem [shape: bf16[128,128], index: 5, kind: input, shape index: {}]   ;;  %s720_s2 = inlined_call_operand.vmem [shape: f32[1,128], index: 2, kind: input, shape index: {}]   ;;  %s721_s4 = inlined_call_operand.vmem [shape: f32[1,128], index: 4, kind: input, shape index: {}]   ;;  %s722_s6 = inlined_call_operand.vmem [shape: f32[1,128], index: 6, kind: input, shape index: {}]   ;;  %s723_s7 = inlined_call_operand.vmem [shape: f32[16,128], index: 7, kind: output, shape index: {}]  }
   0x1   :  { %145 = vmatprep.subr.bf16.mxu0 %v548_v0  ;;  %v517_v1 = vld [vmem:[%s716_s1 + $0x38] sm:$0xff]   ;;  %474 = vmatprep.subr.bf16.mxu1 %v549_v2  ;;  %v518_v3 = vld [vmem:[%s716_s1 + $0x30] sm:$0xff]   ;;  %v519_v4 = vld [vmem:[%s716_s1 + $0x28] sm:$0xff]  }
   0x2   :  { %146 = vmatpush1.bf16.msra.mxu0 %v517_v1  ;;  %v520_v5 = vld [vmem:[%s716_s1 + $0x20] sm:$0xff]   ;;  %v521_v6 = vld [vmem:[%s716_s1 + $0x18] sm:$0xff]   ;;  %v533_v9 = vld [vmem:[%s718_s3 + $0x30] sm:$0xff]   ;;  %490 = vmatprep.mubr.msk.bf16.mxu1 %vm550_vm1, %v549_v2 }
   0x3   :  { %147 = vmatprep.subr.bf16.mxu0 %v548_v0  ;;  %v531_v7 = vld [vmem:[%s717_s0 + $0x4] ss:$8 sps:$4 sm:$0xff]   ;;  %v532_v8 = vld [vmem:[%s718_s3 + $0x38] sm:$0xff]   ;;  %v522_v10 = vld [vmem:[%s716_s1 + $0x10] sm:$0xff]  }
   0x4   :  { %437 = vmatprep.mubr.msk.bf16.mxu0 %vm141_vm0, %v531_v7  ;;  %475 = vmatpush3.bf16.msra.mxu1 %v532_v8  ;;  %v534_v11 = vld [vmem:[%s718_s3 + $0x28] sm:$0xff]   ;;  %v535_v13 = vld [vmem:[%s718_s3 + $0x20] sm:$0xff]   ;;  %v536_v15 = vld [vmem:[%s718_s3 + $0x18] sm:$0xff]  }
   0x5   :  { %476 = vmatprep.subr.bf16.mxu1 %v549_v2  ;;  %v523_v12 = vld [vmem:[%s716_s1 + $0x8] sm:$0xff]   ;;  %v524_v14 = vld [vmem:[%s716_s1] sm:$0xff]   ;;  %v525_v16 = vld [vmem:[%s716_s1 + $0x58] sm:$0xff]  }
   0x6   :  { %148 = vmatpush1.bf16.msra.mxu0 %v518_v3  ;;  %v526_v17 = vld [vmem:[%s716_s1 + $0x50] sm:$0xff]   ;;  %v527_v18 = vld [vmem:[%s716_s1 + $0x48] sm:$0xff]   ;;  %v528_v19 = vld [vmem:[%s716_s1 + $0x40] sm:$0xff]  }
   0x7   :  { %149 = vmatprep.subr.bf16.mxu0 %v548_v0  ;;  %v529_v20 = vld [vmem:[%s717_s0] ss:$8 sps:$4 sm:$0xff]   ;;  %v537_v21 = vld [vmem:[%s718_s3 + $0x10] sm:$0xff]   ;;  %v540_v33 = vld [vmem:[%s719_s5 + $0x38] sm:$0xff]  }
   0x8   :  { %477 = vmatpush3.bf16.msra.mxu1 %v533_v9  ;;  %v538_v22 = vld [vmem:[%s718_s3 + $0x8] sm:$0xff]   ;;  %v539_v23 = vld [vmem:[%s718_s3] sm:$0xff]   ;;  %v541_v35 = vld [vmem:[%s719_s5 + $0x30] sm:$0xff]  }
   0x9   :  { %478 = vmatprep.subr.bf16.mxu1 %v549_v2  ;;  %v422_v24 = vld [vmem:[%s720_s2] ss:$0 sm:$0xff]  ;;  %v542_v36 = vld [vmem:[%s719_s5 + $0x28] sm:$0xff]   ;;  %v544_v38 = vld [vmem:[%s719_s5 + $0x18] sm:$0xff]  }
   0xa   :  { %150 = vmatpush1.bf16.msra.mxu0 %v519_v4  ;;  %v543_v37 = vld [vmem:[%s719_s5 + $0x20] sm:$0xff]   ;;  %v545_v39 = vld [vmem:[%s719_s5 + $0x10] sm:$0xff]   ;;  %v546_v40 = vld [vmem:[%s719_s5 + $0x8] sm:$0xff]  }
   0xb   :  { %151 = vmatprep.subr.bf16.mxu0 %v548_v0  ;;  %v547_v41 = vld [vmem:[%s719_s5] sm:$0xff]  }
   0xc   :  { %479 = vmatpush3.bf16.msra.mxu1 %v534_v11  ;;  %v438_v42 = vld [vmem:[%s721_s4] ss:$0 sm:$0xff] }
   0xd   :  { %480 = vmatprep.subr.bf16.mxu1 %v549_v2  ;;  %v447_v52 = vld [vmem:[%s722_s6] ss:$0 sm:$0xff] }
   0xe   :  { %152 = vmatpush1.bf16.msra.mxu0 %v520_v5 }
   0xf   :  { %153 = vmatprep.subr.bf16.mxu0 %v548_v0 }
  0x10   :  { %481 = vmatpush3.bf16.msra.mxu1 %v535_v13 }
  0x11   :  { %482 = vmatprep.subr.bf16.mxu1 %v549_v2 }
  0x12   :  { %154 = vmatpush1.bf16.msra.mxu0 %v521_v6 }
  0x13   :  { %155 = vmatprep.subr.bf16.mxu0 %v548_v0 }
  0x14   :  { %483 = vmatpush3.bf16.msra.mxu1 %v536_v15 }
  0x15   :  { %484 = vmatprep.subr.bf16.mxu1 %v549_v2 }
  0x16   :  { %156 = vmatpush1.bf16.msra.mxu0 %v522_v10 }
  0x17   :  { %157 = vmatprep.subr.bf16.mxu0 %v548_v0 }
  0x18   :  { %485 = vmatpush3.bf16.msra.mxu1 %v537_v21 }
  0x19   :  { %486 = vmatprep.subr.bf16.mxu1 %v549_v2 }
  0x1a   :  { %158 = vmatpush1.bf16.msra.mxu0 %v523_v12 }
  0x1b   :  { %159 = vmatprep.subr.bf16.mxu0 %v548_v0 }
  0x1c   :  { %487 = vmatpush3.bf16.msra.mxu1 %v538_v22 }
  0x1d   :  { %488 = vmatprep.subr.bf16.mxu1 %v549_v2 }
  0x1e   :  { %160 = vmatpush1.bf16.msra.mxu0 %v524_v14 }
  0x1f   :  { %169 = vmatprep.subr.bf16.mxu0 %v548_v0 }
  0x20   :  { %489 = vmatpush3.bf16.msra.mxu1 %v539_v23 }
  0x21   :  { %494 = vmatprep.subr.bf16.mxu1 %v549_v2 }
  0x22   :  { %170 = vmatpush2.bf16.msra.mxu0 %v525_v16 }
  0x23   :  { %171 = vmatprep.subr.bf16.mxu0 %v548_v0 }
  0x26   :  { %172 = vmatpush2.bf16.msra.mxu0 %v526_v17 }
  0x27   :  { %173 = vmatprep.subr.bf16.mxu0 %v548_v0 }
  0x2a   :  { %174 = vmatpush2.bf16.msra.mxu0 %v527_v18 }
  0x2b   :  { %175 = vmatprep.subr.bf16.mxu0 %v548_v0 }
  0x2e   :  { %176 = vmatpush2.bf16.msra.mxu0 %v528_v19 }
  0x31   :  { %178 = vmatmul.mubr.bf16.vlgmr.msra.gmra.mxu0 %v529_v20 }
  0xf1   :  { %v179_v25 = vpop.f32.mrf.mxu0 }
  0xf2   :  { %v180_v27 = vadd.f32 %v422_v24, %v179_v25 }
  0xf3   :  { %v181_v26 = vpop.f32.mrf.mxu0 }
  0xf4   :  { %v186_v31 = vmax.f32 %v180_v27, 0.0 }
  0xf5   :  { %v182_v28 = vpop.f32.mrf.mxu0 }
  0xf6   :  { %v183_v29 = vadd.f32 %v422_v24, %v182_v28 }
  0xf7   :  { %v184_v30 = vpop.f32.mrf.mxu0 }
  0xf8   :  { %v187_v32 = vmax.f32 %v183_v29, 0.0 }
  0xfa   :  { %v188_v34 = vpack.c.bf16 %v187_v32, %v186_v31 }
  0xfc   :  { %491 = vmatmul.mubr.bf16.vlgmr.msra.gmra.mxu1 %v188_v34 }
  0xfd   :  { %495 = vmatpush3.bf16.msra.mxu1 %v540_v33  ;;  %510 = vmatprep.mubr.msk.bf16.mxu1 %vm550_vm1, %v549_v2 }
  0xfe   :  { %496 = vmatprep.subr.bf16.mxu1 %v549_v2 }
 0x101   :  { %497 = vmatpush3.bf16.msra.mxu1 %v541_v35 }
 0x102   :  { %498 = vmatprep.subr.bf16.mxu1 %v549_v2 }
 0x105   :  { %499 = vmatpush3.bf16.msra.mxu1 %v542_v36 }
 0x106   :  { %500 = vmatprep.subr.bf16.mxu1 %v549_v2 }
 0x109   :  { %501 = vmatpush3.bf16.msra.mxu1 %v543_v37 }
 0x10a   :  { %502 = vmatprep.subr.bf16.mxu1 %v549_v2 }
 0x10d   :  { %503 = vmatpush3.bf16.msra.mxu1 %v544_v38 }
 0x10e   :  { %504 = vmatprep.subr.bf16.mxu1 %v549_v2 }
 0x111   :  { %505 = vmatpush3.bf16.msra.mxu1 %v545_v39 }
 0x112   :  { %506 = vmatprep.subr.bf16.mxu1 %v549_v2 }
 0x115   :  { %507 = vmatpush3.bf16.msra.mxu1 %v546_v40 }
 0x116   :  { %508 = vmatprep.subr.bf16.mxu1 %v549_v2 }
 0x119   :  { %509 = vmatpush3.bf16.msra.mxu1 %v547_v41 }
 0x1bc   :  { %v294_v43 = vpop.f32.mrf.mxu1 }
 0x1bd   :  { %v295_v45 = vadd.f32 %v438_v42, %v294_v43 }
 0x1be   :  { %v492_v44 = vpop.f32.mrf.mxu1 }
 0x1bf   :  { %v301_v49 = vmax.f32 %v295_v45, 0.0 }
 0x1c0   :  { %v297_v46 = vpop.f32.mrf.mxu1 }
 0x1c1   :  { %v298_v47 = vadd.f32 %v438_v42, %v297_v46 }
 0x1c2   :  { %v493_v48 = vpop.f32.mrf.mxu1 }
 0x1c3   :  { %v302_v50 = vmax.f32 %v298_v47, 0.0 }
 0x1c5   :  { %v303_v51 = vpack.c.bf16 %v302_v50, %v301_v49 }
 0x1c7   :  { %511 = vmatmul.mubr.bf16.vlgmr.msra.gmra.mxu1 %v303_v51 }
 0x287   :  { %v409_v53 = vpop.f32.mrf.mxu1 }
 0x288   :  { %v410_v54 = vadd.f32 %v447_v52, %v409_v53 }
 0x289   :  { %v512_v55 = vpop.f32.mrf.mxu1 }
 0x28a   :  { %416 = vst [vmem:[%s723_s7] sm:$0xff] %v410_v54 }
 0x28b   :  { %v412_v56 = vpop.f32.mrf.mxu1 }
 0x28c   :  { %v413_v57 = vadd.f32 %v447_v52, %v412_v56 }
 0x28d   :  { %v513_v58 = vpop.f32.mrf.mxu1 }
 0x28e   :  { %417 = vst [vmem:[%s723_s7 + $0x8] sm:$0xff] %v413_v57 }

</bundles_post_ra>
